<compile_context>
chip_gen: v6e
topology: v6e:2x2x1
jax: 0.10.0
libtpu: 0.0.40
codegen_flags: <defaults>
</compile_context>

<pallas_src>
import functools

import jax
import jax.numpy as jnp
from jax.experimental import pallas as pl
from jax.experimental.pallas import tpu as pltpu

_LANES = 128        # lane width of the 2-D view; each row carries 64 interleaved samples
_MASK_NEG = -1e30   # softplus(-1e30) == 0 exactly in f32


def _ce_kernel(x_ref, m_ref, sum_ref):
    """One (bm, 128) tile of interleaved logits [c0, c1, c0, c1, ...] + per-slot codes."""

    @pl.when(pl.program_id(1) == 0)
    def _init():
        sum_ref[...] = jnp.zeros_like(sum_ref)

    x = x_ref[...]                              # (bm, 128) logits
    mf = m_ref[...].astype(jnp.float32)         # -s on class-0 slot, +s on class-1 slot,
                                                # s = 1-2t, 0 = ignore / padding
    # u is -logit on the target-class slot and +logit on the other slot, so the lane-pair
    # sum is (c_other - c_target) and nll = softplus(c_other - c_target).
    u = x * mf
    z = u + pltpu.roll(u, shift=1, axis=1)      # XLU; pair sum lands on one lane per pair

    # Direction-agnostic "one lane per pair" mask, built once per step on a single
    # (8, 128) tile and broadcast against the data (not regenerated per data vreg).
    lane8 = jax.lax.broadcasted_iota(jnp.int32, (8, _LANES), 1)
    pair8 = lane8 >> 1
    partner_ok8 = pltpu.roll(pair8, shift=1, axis=1) == pair8

    bm = x.shape[0]
    valid3 = (mf != 0.0).reshape(bm // 8, 8, _LANES)
    take = valid3 & partner_ok8                 # (bm//8, 8, 128)

    # Mask before the softplus: non-taken lanes (wrong parity, ignored samples, padding,
    # partial-block VMEM garbage) become -1e30 -> softplus == 0; the select also kills
    # any NaN garbage instead of propagating it.
    zc = jnp.where(take, z.reshape(bm // 8, 8, _LANES), _MASK_NEG)
    nll = jnp.maximum(zc, 0.0) + jnp.log(1.0 + jnp.exp(-jnp.abs(zc)))   # stable softplus

    # Cheap cross-vreg fold into the resident (8, 128) partial sums; the single
    # cross-sublane/cross-lane reduction happens once, in the wrapper.
    sum_ref[...] += jnp.sum(nll, axis=0)


def _num_tensorcores():
    try:
        info = pltpu.get_tpu_info()
        for attr in ("num_cores", "core_count", "num_tensorcores", "tensorcore_count"):
            v = getattr(info, attr, None)
            if v:
                return int(v)
    except Exception:
        pass
    return 1


@functools.partial(jax.jit, static_argnames=("block_rows", "num_parallel"))
def saliency_criterion(outputs, targets, *, block_rows=4096, num_parallel=None):
    """Mean 2-class cross-entropy with ignore_index=-1 (PyTorch SaliencyCriterion)."""
    flat = outputs.reshape(-1)                 # (2N,) interleaved, zero-copy view
    n2 = flat.shape[0]

    # ---- targets -> per-slot int8 sign codes + denominator (from the ORIGINAL targets) ----
    t = targets.reshape(-1).astype(jnp.int32)
    valid = t != -1
    denom = jnp.sum(valid.astype(jnp.float32))
    s8 = jnp.where(valid, 1 - 2 * t, 0).astype(jnp.int8)   # +1 for class 0, -1 for class 1
    codes = jnp.stack([-s8, s8], axis=-1).reshape(-1)      # (2N,) one code per logit slot
    # TODO(synk): targets outside {-1, 0, 1} are silently mis-weighted instead of raising
    # like torch.nn.functional.cross_entropy.

    # ---- logits as a lane-dense (rows, 128) view; zero-copy whenever 2N % 128 == 0 ----
    rows = -(-n2 // _LANES)
    if rows < 32:                               # tiny inputs: keep the row count a multiple of 8
        rows = max(8, ((rows + 7) // 8) * 8)
    pad = rows * _LANES - n2
    if pad:
        # Fallback only for sizes that cannot be viewed as (rows, 128); granularity is
        # 64 samples (not a whole block), so realistic saliency shapes stay zero-copy.
        flat = jnp.pad(flat, (0, pad))
    x2d = flat.reshape(rows, _LANES)

    # ---- tiling ----
    if rows < 32:
        bm = rows                               # single full-array block
    else:
        bm = max(32, (min(int(block_rows), rows) // 32) * 32)
    nc = int(num_parallel) if num_parallel is not None else _num_tensorcores()
    total_blocks = -(-rows // bm)
    nc = max(1, min(nc, total_blocks))
    steps = -(-total_blocks // nc)
    last_block = total_blocks - 1

    # Codes are padded (int8 only, ~2 B/sample worst case) to full grid coverage so code
    # blocks are never partial: m == 0 covers ignored samples, the ragged tail and any
    # redundant grid steps.
    m_rows = nc * steps * bm
    codes = jnp.pad(codes, (0, m_rows * _LANES - n2))
    m2d = codes.reshape(m_rows, _LANES)

    # Redundant trailing grid steps (when nc does not divide total_blocks) re-read the
    # last valid logits block (clamped index); their code block is all zeros, so they
    # contribute nothing.
    x_map = lambda c, s: (jnp.minimum(c * steps + s, last_block), 0)
    m_map = lambda c, s: (c * steps + s, 0)

    cost = pl.CostEstimate(
        flops=10 * rows * _LANES,
        transcendentals=2 * rows * _LANES,
        bytes_accessed=x2d.size * x2d.dtype.itemsize + m2d.size + nc * 8 * _LANES * 4,
    )

    psum = pl.pallas_call(
        _ce_kernel,
        out_shape=jax.ShapeDtypeStruct((nc * 8, _LANES), jnp.float32),
        grid_spec=pltpu.PrefetchScalarGridSpec(
            num_scalar_prefetch=0,
            grid=(nc, steps),
            in_specs=[
                pl.BlockSpec((bm, _LANES), x_map),
                pl.BlockSpec((bm, _LANES), m_map),
            ],
            out_specs=pl.BlockSpec((8, _LANES), lambda c, s: (c, 0)),
        ),
        compiler_params=pltpu.CompilerParams(
            dimension_semantics=("parallel", "arbitrary"),
            vmem_limit_bytes=32 * 1024 * 1024,
        ),
        cost_estimate=cost,
    )(x2d, m2d)

    # Final tiny reduction; 0/0 -> NaN matches PyTorch mean reduction when every sample
    # is ignored.
    return jnp.sum(psum) / denom


def _reference(outputs, targets):
    logits = outputs.reshape(-1, 2).astype(jnp.float32)
    tgt = targets.reshape(-1).astype(jnp.int32)
    lse = jax.scipy.special.logsumexp(logits, axis=-1)
    logit_t = jnp.where(tgt == 1, logits[:, 1], logits[:, 0])
    valid = tgt != -1
    nll = jnp.where(valid, lse - logit_t, 0.0)
    return jnp.sum(nll) / jnp.sum(valid.astype(jnp.float32))


if __name__ == "__main__":
    key = jax.random.PRNGKey(0)
    k1, k2, k3, k4, k5, k6 = jax.random.split(key, 6)

    # Small saliency-style shapes: per-pixel 2-class logits and {-1, 0, 1} labels.
    B, H, W = 2, 16, 16
    outputs = jax.random.normal(k1, (B, H, W, 2), dtype=jnp.float32)
    targets = jax.random.randint(k2, (B, H, W), minval=-1, maxval=2)
    inputs = (None, targets)  # mirrors the PyTorch forward(inputs, outputs) signature

    loss = saliency_criterion(outputs, inputs[1])
    jax.block_until_ready(loss)
    ref = _reference(outputs, inputs[1])
    assert jnp.allclose(loss, ref, rtol=1e-5, atol=1e-5), (loss, ref)

    # Ragged case: exercises the (rare) non-128-aligned pad fallback, a partial last
    # block and the 2-way parallel partial sums with a deliberately small block size.
    n = 5000
    outputs2 = jax.random.normal(k3, (n, 2), dtype=jnp.float32)
    targets2 = jax.random.randint(k4, (n,), minval=-1, maxval=2)
    loss2 = saliency_criterion(outputs2, targets2, block_rows=96, num_parallel=2)
    jax.block_until_ready(loss2)
    ref2 = _reference(outputs2, targets2)
    assert jnp.allclose(loss2, ref2, rtol=1e-5, atol=1e-5), (loss2, ref2)

    # 128-aligned case with an odd number of blocks: exercises the zero-copy logits
    # path, the clamped redundant grid step and a partial final block.
    n = 12800
    outputs3 = jax.random.normal(k5, (n, 2), dtype=jnp.float32)
    targets3 = jax.random.randint(k6, (n,), minval=-1, maxval=2)
    loss3 = saliency_criterion(outputs3, targets3, block_rows=96, num_parallel=2)
    jax.block_until_ready(loss3)
    ref3 = _reference(outputs3, targets3)
    assert jnp.allclose(loss3, ref3, rtol=1e-5, atol=1e-5), (loss3, ref3)

    print("KERNEL_OK")
</pallas_src>

<mosaic_0001>
module attributes {stable_mosaic.version = 11 : i64} {
  func.func @_ce_kernel(%arg0: i32, %arg1: i32, %arg2: memref<8x128xf32, #tpu.memory_space<vmem>>, %arg3: memref<8x128xi8, #tpu.memory_space<vmem>>, %arg4: memref<8x128xf32, #tpu.memory_space<vmem>>) attributes {dimension_semantics = [#tpu.dimension_semantics<parallel>, #tpu.dimension_semantics<arbitrary>], iteration_bounds = array<i64: 1, 1>, scalar_prefetch = 0 : i64, scratch_operands = 0 : i64, tpu.core_type = #tpu.core_type<tc>, window_params = [{transform_indices = @transform_0, window_bounds = array<i64: 8, 128>}, {transform_indices = @transform_1, window_bounds = array<i64: 8, 128>}, {transform_indices = @transform_2, window_bounds = array<i64: 8, 128>}]} {
    %c0_i32 = arith.constant 0 : i32
    %0 = arith.cmpi eq, %arg1, %c0_i32 : i32
    %1 = arith.extui %0 : i1 to i32
    %c0_i32_0 = arith.constant 0 : i32
    %2 = arith.cmpi ne, %1, %c0_i32_0 : i32
    scf.if %2 {
      %cst_15 = arith.constant 0.000000e+00 : f32
      %36 = vector.broadcast %cst_15 : f32 to vector<8x128xf32>
      %c0_16 = arith.constant 0 : index
      %c0_17 = arith.constant 0 : index
      %37 = vector.load %arg4[%c0_16, %c0_17] : memref<8x128xf32, #tpu.memory_space<vmem>>, vector<8x128xf32>
      tpu.vector_store %arg4[%c0_16, %c0_17], %36 {strides = array<i32>} : memref<8x128xf32, #tpu.memory_space<vmem>>, vector<8x128xf32>,
    } else {
    }
    %c0 = arith.constant 0 : index
    %c0_1 = arith.constant 0 : index
    %3 = vector.load %arg2[%c0, %c0_1] : memref<8x128xf32, #tpu.memory_space<vmem>>, vector<8x128xf32>
    %c0_2 = arith.constant 0 : index
    %c0_3 = arith.constant 0 : index
    %4 = vector.load %arg3[%c0_2, %c0_3] : memref<8x128xi8, #tpu.memory_space<vmem>>, vector<8x128xi8>
    %5 = arith.sitofp %4 : vector<8x128xi8> to vector<8x128xf32>
    %6 = arith.mulf %3, %5 : vector<8x128xf32>
    %c1_i32 = arith.constant 1 : i32
    %7 = tpu.dynamic_rotate %6 by %c1_i32 dim 1 : vector<8x128xf32>, i32 -> vector<8x128xf32>
    %8 = arith.addf %6, %7 : vector<8x128xf32>
    %9 = tpu.iota {dimensions = array<i32: 1>} : vector<8x128xi32>
    %c1_i32_4 = arith.constant 1 : i32
    %10 = vector.broadcast %c1_i32_4 : i32 to vector<8x128xi32>
    %11 = arith.shrsi %9, %10 : vector<8x128xi32>
    %c1_i32_5 = arith.constant 1 : i32
    %12 = tpu.dynamic_rotate %11 by %c1_i32_5 dim 1 : vector<8x128xi32>, i32 -> vector<8x128xi32>
    %13 = arith.cmpi eq, %12, %11 : vector<8x128xi32>
    %cst = arith.constant 0.000000e+00 : f32
    %14 = vector.broadcast %cst : f32 to vector<8x128xf32>
    %15 = arith.cmpf one, %5, %14 : vector<8x128xf32>
    %16 = vector.shape_cast %15 : vector<8x128xi1> to vector<1x8x128xi1>
    %17 = vector.shape_cast %13 : vector<8x128xi1> to vector<1x8x128xi1>
    %18 = arith.andi %16, %17 : vector<1x8x128xi1>
    %19 = vector.shape_cast %8 : vector<8x128xf32> to vector<1x8x128xf32>
    %cst_6 = arith.constant -1.000000e+30 : f32
    %20 = vector.broadcast %cst_6 : f32 to vector<1x8x128xf32>
    %21 = arith.select %18, %19, %20 : vector<1x8x128xi1>, vector<1x8x128xf32>
    %cst_7 = arith.constant 0.000000e+00 : f32
    %22 = vector.broadcast %cst_7 : f32 to vector<1x8x128xf32>
    %23 = arith.maximumf %21, %22 : vector<1x8x128xf32>
    %24 = math.absf %21 : vector<1x8x128xf32>
    %cst_8 = arith.constant 0.000000e+00 : f32
    %25 = vector.broadcast %cst_8 : f32 to vector<1x8x128xf32>
    %26 = arith.subf %25, %24 : vector<1x8x128xf32>
    %27 = math.exp %26 : vector<1x8x128xf32>
    %cst_9 = arith.constant 1.000000e+00 : f32
    %28 = vector.broadcast %cst_9 : f32 to vector<1x8x128xf32>
    %29 = arith.addf %28, %27 : vector<1x8x128xf32>
    %30 = math.log %29 : vector<1x8x128xf32>
    %31 = arith.addf %23, %30 : vector<1x8x128xf32>
    %c0_10 = arith.constant 0 : index
    %c0_11 = arith.constant 0 : index
    %32 = vector.load %arg4[%c0_10, %c0_11] : memref<8x128xf32, #tpu.memory_space<vmem>>, vector<8x128xf32>
    %cst_12 = arith.constant dense<0.000000e+00> : vector<8x128xf32>
    %33 = vector.multi_reduction <add>, %31, %cst_12 [0] : vector<1x8x128xf32> to vector<8x128xf32>
    %34 = arith.addf %32, %33 : vector<8x128xf32>
    %c0_13 = arith.constant 0 : index
    %c0_14 = arith.constant 0 : index
    %35 = vector.load %arg4[%c0_13, %c0_14] : memref<8x128xf32, #tpu.memory_space<vmem>>, vector<8x128xf32>
    tpu.vector_store %arg4[%c0_13, %c0_14], %34 {strides = array<i32>} : memref<8x128xf32, #tpu.memory_space<vmem>>, vector<8x128xf32>,
    return
  }
  func.func @transform_0(%arg0: i32, %arg1: i32) -> (i32, i32) {
    %c1_i32 = arith.constant 1 : i32
    %0 = arith.muli %arg0, %c1_i32 : i32
    %1 = arith.addi %0, %arg1 : i32
    %c0_i32 = arith.constant 0 : i32
    %2 = arith.minsi %1, %c0_i32 : i32
    %c0_i32_0 = arith.constant 0 : i32
    %c0_i32_1 = arith.constant 0 : i32
    return %2, %c0_i32_0 : i32, i32
  }
  func.func @transform_1(%arg0: i32, %arg1: i32) -> (i32, i32) {
    %c1_i32 = arith.constant 1 : i32
    %0 = arith.muli %arg0, %c1_i32 : i32
    %1 = arith.addi %0, %arg1 : i32
    %c0_i32 = arith.constant 0 : i32
    %c0_i32_0 = arith.constant 0 : i32
    return %1, %c0_i32 : i32, i32
  }
  func.func @transform_2(%arg0: i32, %arg1: i32) -> (i32, i32) {
    %c0_i32 = arith.constant 0 : i32
    %c0_i32_0 = arith.constant 0 : i32
    return %arg0, %c0_i32 : i32, i32
  }
}

</mosaic_0001>

<bundles_post_ra>
// kernel: neg.7
= control target key start
LH: loop header
LB: loop body
LE: loop exit
PB: predicated region body
PF: predicated region fallthrough
CT: control target
= control target key end

     0   :  { %v71_v12 = vmov 0   ;;  %s106_s0 = inlined_call_operand.vmem [shape: s8[512,1], index: 0, kind: input, shape index: {}]   ;;  %s107_s1 = inlined_call_operand.vmem [shape: s8[512,1], index: 1, kind: output, shape index: {}]  }
   0x1   :  { %v2_v0 = vld [vmem:[%s106_s0] ss:$0 sm:$0xf]  ;;  %v64_v1 = vld [vmem:[%s106_s0 + $0x1] ss:$0 sm:$0xf] }
   0x2   :  { %v3_v2 = vunpack.c.0.s8 %v2_v0  ;;  %v18_v3 = vunpack.c.0.s8 %v64_v1  ;;  %v66_v4 = vld [vmem:[%s106_s0 + $0x2] ss:$0 sm:$0xf]  ;;  %v68_v5 = vld [vmem:[%s106_s0 + $0x3] ss:$0 sm:$0xf] }
   0x3   :  { %v34_v6 = vunpack.c.0.s8 %v66_v4  ;;  %v50_v7 = vunpack.c.0.s8 %v68_v5 }
   0x4   :  { %v9_v8 = vsub.s32 0, %v3_v2  ;;  %v24_v9 = vsub.s32 0, %v18_v3 }
   0x5   :  { %v40_v10 = vsub.s32 0, %v34_v6  ;;  %v56_v11 = vsub.s32 0, %v50_v7 }
   0x6   :  { %v11_v13 = vpack.c.b16 %v71_v12, %v9_v8  ;;  %v27_v14 = vpack.c.b16 %v71_v12, %v24_v9 }
   0x7   :  { %v43_v15 = vpack.c.b16 %v71_v12, %v40_v10  ;;  %v59_v16 = vpack.c.b16 %v71_v12, %v56_v11 }
   0x8   :  { %v12_v17 = vpack.c.b8 %v71_v12, %v11_v13  ;;  %v28_v18 = vpack.c.b8 %v71_v12, %v27_v14 }
   0x9   :  { %v44_v19 = vpack.c.b8 %v71_v12, %v43_v15  ;;  %v60_v20 = vpack.c.b8 %v71_v12, %v59_v16 }
   0xa   :  { %15 = vst [vmem:[%s107_s1] sm:$0x1] %v12_v17  ;;  %65 = vst [vmem:[%s107_s1 + $0x1] sm:$0x1] %v28_v18 }
   0xb   :  { %67 = vst [vmem:[%s107_s1 + $0x2] sm:$0x1] %v44_v19  ;;  %69 = vst [vmem:[%s107_s1 + $0x3] sm:$0x1] %v60_v20 }

// kernel: saliency_criterion.1
= control target key start
LH: loop header
LB: loop body
LE: loop exit
PB: predicated region body
PF: predicated region fallthrough
CT: control target
= control target key end

     0   :  { %v68_v0 = vlaneseq  ;;  %s112_s13 = smov 1   ;;  %s137_s0 = inlined_call_operand.vmem [shape: f32[8,128], index: 0, kind: input, shape index: {}]   ;;  %s138_s1 = inlined_call_operand.vmem [shape: s8[8,128], index: 1, kind: input, shape index: {}]   ;;  %s139_s2 = inlined_call_operand.vmem [shape: f32[8,128], index: 2, kind: output, shape index: {}]  }
   0x1   :  { %v61_v1 = vld [vmem:[%s138_s1] sm:$0x3] }
   0x2   :  { %v62_v2 = vunpack.c.0.s8 %v61_v1  ;;  %v60_v3 = vld [vmem:[%s137_s0] sm:$0xff]  ;;  %v69_v5 = vand.u32 127, %v68_v0 }
   0x4   :  { %v63_v4 = vcvt.s32.f32 %v62_v2  ;;  %v70_v7 = vshra.s32 %v69_v5, 1 }
   0x6   :  { %v64_v6 = vmul.f32 %v63_v4, %v60_v3  ;;  %vm74_vm0 = vcmp.ne.f32.partialorder %v63_v4, 0.0 }
   0x8   :  { %65 = vrot.lane.b32.xlu0 %v64_v6, %s112_s13 }
   0xc   :  { %71 = vrot.lane.b32.xlu0 %v70_v7, %s112_s13 }
  0x7a   :  { %v66_v8 = vpop.permute.xlu0 %65 }
  0x7b   :  { %v67_v10 = vadd.f32 %v66_v8, %v64_v6 }
  0x7e   :  { %v72_v9 = vpop.permute.xlu0 %71 }
  0x7f   :  { %vm73_vm1 = vcmp.eq.s32.totalorder %v72_v9, %v70_v7 }
  0x80   :  { %vm75_vm2 = vmand %vm74_vm0, %vm73_vm1 }
  0x81   :  { %v76_v11 = vsel %vm75_vm2, %v67_v10, -1e+30 }
  0x82   :  { %v78_v12 = vand.u32 2147483647, %v76_v11  ;;  %v77_v18 = vmax.f32 %v76_v11, 0.0 }
  0x84   :  { %v79_v13 = vsub.f32 0.0, %v78_v12 }
  0x86   :  { %v80_v14 = vmul.f32 1.442695, %v79_v13 }
  0x88   :  { %108 = vpow2.f32 %v80_v14 }
  0x95   :  { %v109_v15 = vpop.eup %108 }
  0x96   :  { %v82_v16 = vadd.f32 1.0, %v109_v15 }
  0x98   :  { %110 = vlog2.f32 %v82_v16 }
  0xa5   :  { %v111_v17 = vpop.eup %110 }
  0xa6   :  { %v84_v19 = vmul.f32 0.6931472, %v111_v17 }
  0xa8   :  { %v85_v20 = vadd.f32 %v84_v19, %v77_v18 }
  0xaa   :  { %89 = vst [vmem:[%s139_s2] sm:$0xff] %v85_v20 }

</bundles_post_ra>
